<compile_context>
chip_gen: v5e
topology: v5e:2x2
jax: 0.10.0
libtpu: 0.0.40
codegen_flags: <defaults>
</compile_context>

<pallas_src>
import functools

import jax
import jax.numpy as jnp
from jax import lax
from jax.experimental import pallas as pl
from jax.experimental.pallas import tpu as pltpu

LANES = 128
SUBLANES = 8
CHUNK_ROWS = 1024                      # in-kernel compute chunk: (1024, 128)
MAX_BLOCK_BYTES = 4 * 1024 * 1024      # 4 MiB per input block (v7x-safe)
VMEM_LIMIT_BYTES = 32 * 1024 * 1024    # 2 inputs x 2 buffers x 4 MiB + headroom


def _round_up(x, m):
    return ((x + m - 1) // m) * m


def _alpha_mode(alpha):
    a = float(alpha)
    if a == int(a) and 0 <= int(a) <= 16:
        return "int"
    if a >= 0 and 2.0 * a == int(2.0 * a) and int(a) <= 16:
        return "half"
    return "general"


def _int_pow(x, n):
    """x ** n for small non-negative integer n, unrolled into VPU multiplies."""
    result = None
    p = x
    while n:
        if n & 1:
            result = p if result is None else result * p
        n >>= 1
        if n:
            p = p * p
    return result if result is not None else jnp.ones_like(x)


def _weights(abs_err, alpha):
    """(|err| + 1) ** alpha, using the cheapest unit mix for the exponent."""
    a = float(alpha)
    mode = _alpha_mode(a)
    t = abs_err + 1.0
    if mode == "int":
        return _int_pow(t, int(a))                        # VPU only
    if mode == "half":
        return _int_pow(t, int(a)) * jnp.sqrt(t)          # VPU + 1 EUP op/elem
    return jnp.exp(jnp.float32(a) * jnp.log1p(abs_err))   # 2 EUP ops/elem


def _tensorcores_per_device():
    """TensorCores one Pallas kernel can span: 2 on v7x, 1 on v5e/v6e."""
    try:
        kind = jax.devices()[0].device_kind.lower()
    except Exception:
        return 1
    return 2 if ("v7" in kind or "tpu7" in kind or "7x" in kind) else 1


def _ofl_kernel(pred_ref, true_ref, acc_ref, *, alpha, total_rows, block_rows,
                chunk_rows, num_blocks, steps_per_core, needs_mask):
    """Accumulate per-core partial sums of (|e|+1)^alpha * |e| into acc_ref."""
    c = pl.program_id(0)   # core-split axis (CORE_PARALLEL on v7x)
    j = pl.program_id(1)   # sequential reduction axis ("arbitrary")

    @pl.when(j == 0)
    def _():
        acc_ref[...] = jnp.zeros_like(acc_ref)

    linear = c * steps_per_core + j          # logical block id of this step
    num_chunks = block_rows // chunk_rows

    def block_partial(masked):
        block_row0 = linear * block_rows

        def chunk_contrib(r0):
            p = pred_ref[pl.ds(r0, chunk_rows), :].astype(jnp.float32)
            t = true_ref[pl.ds(r0, chunk_rows), :].astype(jnp.float32)
            err = t - p
            if masked:
                # Mask BEFORE abs/pow so garbage in out-of-bounds / duplicated
                # rows can never reach the sum (or produce inf/NaN).
                row_ids = lax.broadcasted_iota(jnp.int32, (chunk_rows, LANES), 0)
                err = jnp.where(block_row0 + r0 + row_ids < total_rows, err, 0.0)
            abs_err = jnp.abs(err)
            contrib = _weights(abs_err, alpha) * abs_err
            # Reduce only along the major axis (pure VPU adds) -> (8, 128).
            return contrib.reshape(chunk_rows // SUBLANES, SUBLANES, LANES).sum(axis=0)

        if num_chunks == 1:
            return chunk_contrib(0)

        def body(i, part):
            r0 = pl.multiple_of(i * chunk_rows, chunk_rows)
            return part + chunk_contrib(r0)

        return lax.fori_loop(0, num_chunks, body,
                             jnp.zeros((SUBLANES, LANES), jnp.float32))

    if needs_mask:
        # Only the last logical block can be ragged; blocks past num_blocks are
        # clamped duplicates that mask to all-zero.  Every other block takes
        # the unmasked fast path (no iota / compare / select on the hot path).
        @pl.when(linear < num_blocks - 1)
        def _():
            acc_ref[...] += block_partial(False)[None]

        @pl.when(linear >= num_blocks - 1)
        def _():
            acc_ref[...] += block_partial(True)[None]
    else:
        acc_ref[...] += block_partial(False)[None]


def _pallas_sum(pred2d, true2d, alpha, rows, block_rows, chunk_rows, num_blocks,
                num_splits):
    """Sum of (|e|+1)^alpha * |e| over a (rows, 128) pair via the Pallas kernel."""
    steps_per_core = -(-num_blocks // num_splits)
    needs_mask = (rows % block_rows != 0) or (num_splits * steps_per_core > num_blocks)

    def in_map(c, j):
        # Clamp so the DMA never targets a block past the array end; the kernel
        # masks out the (at most one per core) duplicated block.
        return (jnp.minimum(c * steps_per_core + j, num_blocks - 1), 0)

    kernel = functools.partial(
        _ofl_kernel, alpha=float(alpha), total_rows=rows, block_rows=block_rows,
        chunk_rows=chunk_rows, num_blocks=num_blocks,
        steps_per_core=steps_per_core, needs_mask=needs_mask)

    if num_splits > 1:
        # Real 2-TensorCore split on v7x; "parallel" fallback if unavailable.
        lead_sem = getattr(pltpu, "CORE_PARALLEL", "parallel")
    else:
        lead_sem = "arbitrary"

    n_main = rows * LANES
    trans_per_elem = {"int": 0, "half": 1, "general": 2}[_alpha_mode(alpha)]
    cost = pl.CostEstimate(
        flops=6 * n_main,
        transcendentals=trans_per_elem * n_main,
        bytes_accessed=rows * LANES * (jnp.dtype(pred2d.dtype).itemsize
                                       + jnp.dtype(true2d.dtype).itemsize)
        + num_splits * SUBLANES * LANES * 4)

    partials = pl.pallas_call(
        kernel,
        out_shape=jax.ShapeDtypeStruct((num_splits, SUBLANES, LANES), jnp.float32),
        grid_spec=pltpu.PrefetchScalarGridSpec(
            num_scalar_prefetch=0,
            grid=(num_splits, steps_per_core),
            in_specs=[pl.BlockSpec((block_rows, LANES), in_map),
                      pl.BlockSpec((block_rows, LANES), in_map)],
            out_specs=pl.BlockSpec((1, SUBLANES, LANES), lambda c, j: (c, 0, 0)),
        ),
        compiler_params=pltpu.CompilerParams(
            dimension_semantics=(lead_sem, "arbitrary"),
            vmem_limit_bytes=VMEM_LIMIT_BYTES),
        cost_estimate=cost,
    )(pred2d, true2d)

    # Tiny final reduce of the lane-dense partials happens in XLA.
    return jnp.sum(partials)


def _elementwise_loss(pred, true, alpha):
    err = true.astype(jnp.float32) - pred.astype(jnp.float32)
    abs_err = jnp.abs(err)
    return jnp.power(abs_err + 1.0, jnp.float32(alpha)) * abs_err


def outlier_focused_loss(y_pred, y_true, alpha):
    """Pallas implementation of OutlierFocusedLoss.forward (returns scalar mean)."""
    assert y_pred.shape == y_true.shape
    n_elems = y_pred.size
    assert n_elems > 0

    # Keep native dtype (kernel casts); ravel/reshape of a contiguous array is a
    # bitcast, so for n % 128 == 0 (the common case) there is NO extra copy.
    pred_flat = jnp.ravel(y_pred)
    true_flat = jnp.ravel(y_true)

    rows = n_elems // LANES
    tail = n_elems - rows * LANES

    total = jnp.zeros((), jnp.float32)
    if tail:  # <128-element tail: a few plain jnp ops, no full-array pad copy.
        total = total + jnp.sum(_elementwise_loss(
            pred_flat[rows * LANES:], true_flat[rows * LANES:], alpha))

    if rows:
        pred_main = pred_flat if tail == 0 else pred_flat[: rows * LANES]
        true_main = true_flat if tail == 0 else true_flat[: rows * LANES]
        pred2d = pred_main.reshape(rows, LANES)
        true2d = true_main.reshape(rows, LANES)

        # Block rows sized by BYTES (4 MiB per input, dtype-aware) and kept a
        # multiple of the in-kernel chunk so the chunked reduction tiles evenly.
        itemsize = max(jnp.dtype(pred2d.dtype).itemsize,
                       jnp.dtype(true2d.dtype).itemsize)
        max_block_rows = max(
            CHUNK_ROWS,
            (MAX_BLOCK_BYTES // (LANES * itemsize)) // CHUNK_ROWS * CHUNK_ROWS)
        if rows > CHUNK_ROWS:
            block_rows = min(max_block_rows, _round_up(rows, CHUNK_ROWS))
            chunk_rows = CHUNK_ROWS
        else:
            block_rows = _round_up(rows, SUBLANES)
            chunk_rows = block_rows
        num_blocks = -(-rows // block_rows)

        num_splits = _tensorcores_per_device() if num_blocks > 1 else 1
        num_splits = min(num_splits, num_blocks)

        main_sum = None
        if num_splits > 1:
            try:
                main_sum = _pallas_sum(pred2d, true2d, alpha, rows, block_rows,
                                       chunk_rows, num_blocks, num_splits)
            except Exception:
                main_sum = None   # conservative fallback on exotic/1-TC chips
        if main_sum is None:
            main_sum = _pallas_sum(pred2d, true2d, alpha, rows, block_rows,
                                   chunk_rows, num_blocks, 1)
        total = total + main_sum

    # Mean over the ORIGINAL element count.
    return total / jnp.float32(n_elems)


def _reference(y_pred, y_true, alpha):
    err = y_true.astype(jnp.float32) - y_pred.astype(jnp.float32)
    ae = jnp.abs(err)
    return jnp.mean(jnp.power(ae + 1.0, alpha) * ae)


if __name__ == "__main__":
    key = jax.random.PRNGKey(0)
    k1, k2, k3, k4, k5, k6 = jax.random.split(key, 6)

    # TODO(synk): the module's `device` arg / .to(device) has no JAX analogue;
    # device placement is handled by JAX itself.

    # 1) Small NCHW-like regression output/target pair (integer-alpha VPU path,
    #    size divisible by 128 -> no copies, no masking).
    shape = (2, 4, 16, 16)
    y_pred = jax.random.normal(k1, shape, dtype=jnp.float32)
    y_true = jax.random.normal(k2, shape, dtype=jnp.float32)
    loss = jax.block_until_ready(outlier_focused_loss(y_pred, y_true, 2.0))
    ref = _reference(y_pred, y_true, 2.0)
    assert jnp.allclose(loss, ref, rtol=1e-5, atol=1e-5), (loss, ref)

    # 2) Half-integer alpha + element count not a multiple of 128 (exercises the
    #    sqrt path, ragged-row masking, and the jnp lane-tail sum).
    shape2 = (2, 4, 5, 25)   # 1000 elements
    y_pred2 = jax.random.normal(k3, shape2, dtype=jnp.float32)
    y_true2 = jax.random.normal(k4, shape2, dtype=jnp.float32)
    loss2 = jax.block_until_ready(outlier_focused_loss(y_pred2, y_true2, 1.5))
    ref2 = _reference(y_pred2, y_true2, 1.5)
    assert jnp.allclose(loss2, ref2, rtol=1e-4, atol=1e-6), (loss2, ref2)

    # 3) Larger input: multiple blocks along the reduction grid axis, chunked
    #    fori_loop inside the kernel, ragged last block, general-alpha EUP path.
    shape3 = (2, 4, 380, 384)   # 1,167,360 elements = 9120 rows of 128
    y_pred3 = jax.random.normal(k5, shape3, dtype=jnp.float32)
    y_true3 = jax.random.normal(k6, shape3, dtype=jnp.float32)
    loss3 = jax.block_until_ready(outlier_focused_loss(y_pred3, y_true3, 1.75))
    ref3 = _reference(y_pred3, y_true3, 1.75)
    assert jnp.allclose(loss3, ref3, rtol=1e-4, atol=1e-6), (loss3, ref3)

    print("KERNEL_OK")
</pallas_src>

<mosaic_0001>
module attributes {stable_mosaic.version = 11 : i64} {
  func.func @_ofl_kernel(%arg0: i32, %arg1: i32, %arg2: memref<16x128xf32, #tpu.memory_space<vmem>>, %arg3: memref<16x128xf32, #tpu.memory_space<vmem>>, %arg4: memref<1x8x128xf32, #tpu.memory_space<vmem>>) attributes {dimension_semantics = [#tpu.dimension_semantics<arbitrary>, #tpu.dimension_semantics<arbitrary>], iteration_bounds = array<i64: 1, 1>, scalar_prefetch = 0 : i64, scratch_operands = 0 : i64, tpu.core_type = #tpu.core_type<tc>, window_params = [{transform_indices = @transform_0, window_bounds = array<i64: 16, 128>}, {transform_indices = @transform_1, window_bounds = array<i64: 16, 128>}, {transform_indices = @transform_2, window_bounds = array<i64: 1, 8, 128>}]} {
    %c0_i32 = arith.constant 0 : i32
    %0 = arith.cmpi eq, %arg1, %c0_i32 : i32
    %1 = arith.extui %0 : i1 to i32
    %c0_i32_0 = arith.constant 0 : i32
    %2 = arith.cmpi ne, %1, %c0_i32_0 : i32
    scf.if %2 {
      %cst_11 = arith.constant 0.000000e+00 : f32
      %17 = vector.broadcast %cst_11 : f32 to vector<1x8x128xf32>
      %c0_12 = arith.constant 0 : index
      %c0_13 = arith.constant 0 : index
      %c0_14 = arith.constant 0 : index
      %18 = vector.load %arg4[%c0_12, %c0_13, %c0_14] : memref<1x8x128xf32, #tpu.memory_space<vmem>>, vector<1x8x128xf32>
      tpu.vector_store %arg4[%c0_12, %c0_13, %c0_14], %17 {strides = array<i32>} : memref<1x8x128xf32, #tpu.memory_space<vmem>>, vector<1x8x128xf32>,
    } else {
    }
    %c0 = arith.constant 0 : index
    %c0_1 = arith.constant 0 : index
    %c0_2 = arith.constant 0 : index
    %3 = vector.load %arg4[%c0, %c0_1, %c0_2] : memref<1x8x128xf32, #tpu.memory_space<vmem>>, vector<1x8x128xf32>
    %c0_3 = arith.constant 0 : index
    %c0_4 = arith.constant 0 : index
    %4 = vector.load %arg2[%c0_3, %c0_4] : memref<16x128xf32, #tpu.memory_space<vmem>>, vector<16x128xf32>
    %c0_5 = arith.constant 0 : index
    %c0_6 = arith.constant 0 : index
    %5 = vector.load %arg3[%c0_5, %c0_6] : memref<16x128xf32, #tpu.memory_space<vmem>>, vector<16x128xf32>
    %6 = arith.subf %5, %4 : vector<16x128xf32>
    %7 = math.absf %6 : vector<16x128xf32>
    %cst = arith.constant 1.000000e+00 : f32
    %8 = vector.broadcast %cst : f32 to vector<16x128xf32>
    %9 = arith.addf %7, %8 : vector<16x128xf32>
    %10 = arith.mulf %9, %9 : vector<16x128xf32>
    %11 = arith.mulf %10, %7 : vector<16x128xf32>
    %12 = vector.shape_cast %11 : vector<16x128xf32> to vector<2x8x128xf32>
    %cst_7 = arith.constant dense<0.000000e+00> : vector<8x128xf32>
    %13 = vector.multi_reduction <add>, %12, %cst_7 [0] : vector<2x8x128xf32> to vector<8x128xf32>
    %14 = vector.shape_cast %13 : vector<8x128xf32> to vector<1x8x128xf32>
    %15 = arith.addf %3, %14 : vector<1x8x128xf32>
    %c0_8 = arith.constant 0 : index
    %c0_9 = arith.constant 0 : index
    %c0_10 = arith.constant 0 : index
    %16 = vector.load %arg4[%c0_8, %c0_9, %c0_10] : memref<1x8x128xf32, #tpu.memory_space<vmem>>, vector<1x8x128xf32>
    tpu.vector_store %arg4[%c0_8, %c0_9, %c0_10], %15 {strides = array<i32>} : memref<1x8x128xf32, #tpu.memory_space<vmem>>, vector<1x8x128xf32>,
    return
  }
  func.func @transform_0(%arg0: i32, %arg1: i32) -> (i32, i32) {
    %c1_i32 = arith.constant 1 : i32
    %0 = arith.muli %arg0, %c1_i32 : i32
    %1 = arith.addi %0, %arg1 : i32
    %c0_i32 = arith.constant 0 : i32
    %2 = arith.minsi %1, %c0_i32 : i32
    %c0_i32_0 = arith.constant 0 : i32
    %c0_i32_1 = arith.constant 0 : i32
    return %2, %c0_i32_0 : i32, i32
  }
  func.func @transform_1(%arg0: i32, %arg1: i32) -> (i32, i32) {
    %c1_i32 = arith.constant 1 : i32
    %0 = arith.muli %arg0, %c1_i32 : i32
    %1 = arith.addi %0, %arg1 : i32
    %c0_i32 = arith.constant 0 : i32
    %2 = arith.minsi %1, %c0_i32 : i32
    %c0_i32_0 = arith.constant 0 : i32
    %c0_i32_1 = arith.constant 0 : i32
    return %2, %c0_i32_0 : i32, i32
  }
  func.func @transform_2(%arg0: i32, %arg1: i32) -> (i32, i32, i32) {
    %c0_i32 = arith.constant 0 : i32
    %c0_i32_0 = arith.constant 0 : i32
    %c0_i32_1 = arith.constant 0 : i32
    return %arg0, %c0_i32, %c0_i32_0 : i32, i32, i32
  }
}

</mosaic_0001>

<bundles_post_ra>
// kernel: tpu_custom_call.1
= control target key start
LH: loop header
LB: loop body
LE: loop exit
PB: predicated region body
PF: predicated region fallthrough
CT: control target
= control target key end

     0   :  { %7 = vsyncpa [#allocation3], 0  ;;  %s222_s0 = inlined_call_operand.hbm [shape: f32[16,128], index: 0, kind: input, shape index: {}]   ;;  %s223_s1 = inlined_call_operand.hbm [shape: f32[16,128], index: 1, kind: input, shape index: {}]   ;;  %s224_s2 = inlined_call_operand.hbm [shape: f32[1,8,128], index: 2, kind: output, shape index: {}]  }
   0x1   :  { %8 = vsyncpa [#allocation6], 0 }
   0x2   :  { %9 = vsyncpa [#allocation4], 0  ;;  %s20_s11 = sshll.u32 %s222_s0, 4  ;;  %s193_s12 = smov [#allocation2]   ;;  %s21_s11 = int_to_ptr.hbm [resolvable:$true] %s20_s11 }
   0x3   :  { %s22_s13 = sshll.u32 %s193_s12, 4  ;;  %s39_s16 = sshll.u32 %s223_s1, 4  ;;  %s23_s13 = int_to_ptr.vmem [resolvable:$true] %s22_s13  ;;  %s40_s16 = int_to_ptr.hbm [resolvable:$true] %s39_s16 }
   0x4   :  { %s194_s17 = smov 128   ;;  %s195_s18 = smov 8  }
   0x5   :  { %28 = dma.hbm_to_vmem [thread:$0]  %s21_s11, 256, %s23_s13, [#allocation3], %s194_s17, %s194_s17, %s195_s18  }
   0x6   :  { %s196_s19 = smov [#allocation5]  }
   0x7   :  { %s41_s20 = sshll.u32 %s196_s19, 4  ;;  %s42_s20 = int_to_ptr.vmem [resolvable:$true] %s41_s20 }
   0x8   :  { %47 = dma.hbm_to_vmem [thread:$0]  %s40_s16, 256, %s42_s20, [#allocation6], %s194_s17, %s194_s17, %s195_s18  }
   0x9   :  { %187 = dma.done.wait [#allocation3], 256  }
   0xa   :  { %188 = vsyncadd [#allocation3], 4294967040 }
   0xb   :  { %189 = dma.done.wait [#allocation6], 256  }
   0xc   :  { %190 = vsyncadd [#allocation6], 4294967040  ;;  %v70_v0 = vld [vmem:[#allocation2] sm:$0xff]  ;;  %v71_v1 = vld [vmem:[#allocation2 + $0x8] sm:$0xff]  ;;  %s197_s0 = smov [#allocation7]   ;;  %s94_s23 = sshll.u32 %s224_s2, 4  ;;  %s95_s23 = int_to_ptr.hbm [resolvable:$true] %s94_s23 }
   0xd   :  { %v72_v2 = vld [vmem:[#allocation5] sm:$0xff]  ;;  %v73_v3 = vld [vmem:[#allocation5 + $0x8] sm:$0xff]  ;;  %s92_s1 = sshll.u32 %s197_s0, 4  ;;  %s93_s1 = int_to_ptr.vmem [resolvable:$true] %s92_s1 }
   0xe   :  { %v74_v4 = vsub.f32 %v72_v2, %v70_v0  ;;  %v75_v5 = vsub.f32 %v73_v3, %v71_v1 }
  0x10   :  { %v76_v6 = vand.u32 2147483647, %v74_v4  ;;  %v77_v7 = vand.u32 2147483647, %v75_v5 }
  0x12   :  { %v78_v8 = vadd.f32 1.0, %v76_v6  ;;  %v79_v9 = vadd.f32 1.0, %v77_v7 }
  0x14   :  { %v80_v10 = vmul.f32 %v78_v8, %v78_v8  ;;  %v81_v11 = vmul.f32 %v79_v9, %v79_v9 }
  0x16   :  { %v82_v12 = vmul.f32 %v80_v10, %v76_v6  ;;  %v83_v13 = vmul.f32 %v81_v11, %v77_v7 }
  0x18   :  { %v84_v14 = vadd.f32 %v83_v13, %v82_v12 }
  0x1a   :  { %86 = vst [vmem:[#allocation7] sm:$0xff] %v84_v14 }
  0x1b   :  { %97 = dma.vmem_to_hbm [thread:$0]  %s93_s1, 128, %s95_s23, [#allocation4]  }
  0x1c   :  { %191 = dma.done.wait [#allocation4], 128  }
  0x1d   :  { %192 = vsyncadd [#allocation4], 4294967168 }
  0x1e   :  { %102 = vsyncpa [#allocation3], 1 }
  0x1f   :  { %103 = vsyncpa [#allocation6], 1 }
  0x20   :  { %104 = vsyncpa [#allocation4], 1 }

</bundles_post_ra>
